<compile_context>
chip_gen: v5e
topology: v5e:2x2
jax: 0.10.0
libtpu: 0.0.40
codegen_flags: <defaults>
</compile_context>

<pallas_src>
import functools
import math

import jax
import jax.numpy as jnp
from jax.experimental import pallas as pl
from jax.experimental.pallas import tpu as pltpu

LN_EPS = 1e-12  # BERT LayerNorm eps


# ----------------------------- shared math helpers -----------------------------
def _layernorm(x, g, b):
    mu = jnp.mean(x, axis=-1, keepdims=True)
    var = jnp.mean(jnp.square(x - mu), axis=-1, keepdims=True)
    return (x - mu) * jax.lax.rsqrt(var + LN_EPS) * g + b


def _gelu(x):
    # TODO(synk): HF BERT uses erf-based GELU; tanh approximation used instead
    # (max abs diff ~1e-3 on unit-scale inputs).
    c = math.sqrt(2.0 / math.pi)
    return 0.5 * x * (1.0 + jnp.tanh(c * (x + 0.044715 * x * x * x)))


def _proj(x, w, b):
    # bf16 matmul operands (MXU-native), f32 accumulation, f32 bias add.
    return jnp.dot(x.astype(w.dtype), w, preferred_element_type=jnp.float32) + b


def _softmax_kernel(x):
    m = jnp.max(x, axis=-1, keepdims=True)
    e = jnp.exp(x - m)
    # approx reciprocal runs on the otherwise-idle EUP slot; normalize is a VPU mul.
    return e * pl.reciprocal(jnp.sum(e, axis=-1, keepdims=True), approx=True)


def _softmax_ref(x):
    m = jnp.max(x, axis=-1, keepdims=True)
    e = jnp.exp(x - m)
    return e / jnp.sum(e, axis=-1, keepdims=True)


# rows of the packed per-layer (8, H) vector operand
_BO, _LN1G, _LN1B, _B2, _LN2G, _LN2B, _INLNG, _INLNB = range(8)


# --------------------------------- Pallas kernel --------------------------------
def bert_layer_kernel(x_ref, bias_ref, wqkv_ref, bqkv_ref, wo_ref,
                      w1_ref, b1_ref, w2_ref, vecs_ref,
                      o_ref, ctx_ref, *, num_heads, block_b, seq, apply_input_ln):
    H = x_ref.shape[-1]
    dh = H // num_heads
    scale = 1.0 / math.sqrt(dh)
    M = block_b * seq

    x = x_ref[...].reshape(M, H)                                   # (Bt*S, H) f32
    if apply_input_ln:
        # embedding LayerNorm fused into the first encoder layer (saves one full
        # (B,S,H) HBM round trip of a standalone LN kernel).
        x = _layernorm(x, vecs_ref[_INLNG:_INLNG + 1, :], vecs_ref[_INLNB:_INLNB + 1, :])

    # ---- fused QKV: ONE (M,H)@(H,3H) MXU matmul, f32 accumulation --------------
    x_mm = x.astype(jnp.bfloat16)
    qkv = jnp.dot(x_mm, wqkv_ref[...], preferred_element_type=jnp.float32) + bqkv_ref[...]
    q = qkv[:, 0 * H:1 * H] * scale          # fold 1/sqrt(dh) once, in f32
    k = qkv[:, 1 * H:2 * H]
    v = qkv[:, 2 * H:3 * H]
    qb = q.astype(jnp.bfloat16)
    kb = k.astype(jnp.bfloat16)
    vb = v.astype(jnp.bfloat16)

    # heads per group: make the ctx-scratch store width a multiple of the 128-lane
    # vreg tile when possible (head pairs for BERT-base dh=64).
    if dh >= 128 or H < 128:
        group = 1 if dh >= 128 else num_heads
    else:
        group = max(1, 128 // dh)
        while num_heads % group:
            group -= 1

    # ---- attention, per sequence (softmax over the full key axis) --------------
    for b in range(block_b):
        rows = slice(b * seq, (b + 1) * seq)
        q_s, k_s, v_s = qb[rows], kb[rows], vb[rows]
        bias_row = bias_ref[b]                                     # (1, S) additive key mask
        for g0 in range(0, num_heads, group):
            parts = []
            for h in range(g0, g0 + group):
                sl = slice(h * dh, (h + 1) * dh)
                # contract dh of both operands directly: no kh.T transpose materialized
                s = jax.lax.dot_general(q_s[:, sl], k_s[:, sl],
                                        (((1,), (1,)), ((), ())),
                                        preferred_element_type=jnp.float32)
                s = s + bias_row                                   # (S,S)+(1,S) stride-0 bcast
                p = _softmax_kernel(s)
                parts.append(jnp.dot(p.astype(jnp.bfloat16), v_s[:, sl],
                                     preferred_element_type=jnp.float32))
            blk = parts[0] if group == 1 else jnp.concatenate(parts, axis=-1)
            # group-wide store into the ctx scratch bounds live ranges per group
            ctx_ref[b, :, g0 * dh:(g0 + group) * dh] = blk

    # ---- single big output projection (head concat folded into one K=H matmul) --
    ctx = ctx_ref[...].reshape(M, H).astype(jnp.bfloat16)
    attn = jnp.dot(ctx, wo_ref[...], preferred_element_type=jnp.float32) \
        + vecs_ref[_BO:_BO + 1, :]

    # residual + LayerNorm 1 (f32 elementwise)
    y = _layernorm(x + attn, vecs_ref[_LN1G:_LN1G + 1, :], vecs_ref[_LN1B:_LN1B + 1, :])

    # ---- FFN: GELU(y @ W1 + b1) @ W2 + b2 ---------------------------------------
    # TODO(synk): for BERT-base on v7x (64 MiB VMEM/TC) stream W1/W2 in I-chunks
    # (pltpu.emit_pipeline) instead of keeping both fully resident.
    hmid = _gelu(jnp.dot(y.astype(jnp.bfloat16), w1_ref[...],
                         preferred_element_type=jnp.float32) + b1_ref[...])
    ffn = jnp.dot(hmid.astype(jnp.bfloat16), w2_ref[...],
                  preferred_element_type=jnp.float32) + vecs_ref[_B2:_B2 + 1, :]

    # residual + LayerNorm 2
    out = _layernorm(y + ffn, vecs_ref[_LN2G:_LN2G + 1, :], vecs_ref[_LN2B:_LN2B + 1, :])
    o_ref[...] = out.reshape(block_b, seq, H)


# --------------------------------- wrappers -------------------------------------
@functools.lru_cache(maxsize=None)
def _single_buffer_supported():
    """Explicit capability probe: does this build accept pl.Buffered(1) input specs?"""
    def probe_kernel(x_ref, o_ref):
        o_ref[...] = x_ref[...] + 1.0
    try:
        fn = pl.pallas_call(
            probe_kernel,
            out_shape=jax.ShapeDtypeStruct((8, 128), jnp.float32),
            grid=(1,),
            in_specs=[pl.BlockSpec((8, 128), lambda i: (0, 0),
                                   pipeline_mode=pl.Buffered(1))],
            out_specs=pl.BlockSpec((8, 128), lambda i: (0, 0)),
        )
        jax.block_until_ready(fn(jnp.zeros((8, 128), jnp.float32)))
        return True
    except Exception:
        return False


@functools.lru_cache(maxsize=None)
def _vmem_limit_bytes():
    """Generation-aware scoped-VMEM limit (v7x has 64 MiB/TC vs 128 MiB on v5e/v6e)."""
    try:
        cap = int(pltpu.get_tpu_info().vmem_capacity_bytes)
    except Exception:
        cap = 64 * 1024 * 1024               # conservative: v7x per-TC size
    headroom = 16 * 1024 * 1024              # compiler scratch + double-buffered x/out
    return int(min(max(cap - headroom, 16 * 1024 * 1024), 96 * 1024 * 1024))


def _const_spec(shape, single_buffer):
    # Weight/bias operands: block index constant across the batch grid -> the second
    # pipeline buffer is pure waste; request single buffering when supported.
    ndim = len(shape)
    if single_buffer:
        return pl.BlockSpec(shape, lambda b: (0,) * ndim, pipeline_mode=pl.Buffered(1))
    return pl.BlockSpec(shape, lambda b: (0,) * ndim)


def _pick_block_batch(batch, seq):
    """Rows per grid step: aim for ~256 matmul rows (fills the MXU) while keeping
    >= 2 grid steps for megacore / dual-TC when the batch allows, and Bt | B.
    (At BERT-base shapes also bound Bt by the VMEM budget.)"""
    bt = max(1, min(batch, max(1, 256 // max(seq, 1))))
    while bt > 1 and (batch // bt) < 2:
        bt -= 1
    while batch % bt:
        bt -= 1
    return bt


def bert_layer(x, mask_bias, lp, num_heads, *, apply_input_ln=False,
               in_ln_g=None, in_ln_b=None):
    B, S, H = x.shape
    I = lp["w1"].shape[1]
    bt = _pick_block_batch(B, S)
    nb = B // bt

    # fused / packed operands (in production these would be packed once, offline)
    wqkv = jnp.concatenate([lp["wq"], lp["wk"], lp["wv"]], axis=1)        # (H, 3H) bf16
    bqkv = jnp.concatenate([lp["bq"], lp["bk"], lp["bv"]], axis=1)        # (1, 3H) f32
    if in_ln_g is None:
        in_ln_g = jnp.ones((1, H), jnp.float32)
        in_ln_b = jnp.zeros((1, H), jnp.float32)
    vecs = jnp.concatenate([lp["bo"], lp["ln1_g"], lp["ln1_b"],
                            lp["b2"], lp["ln2_g"], lp["ln2_b"],
                            in_ln_g, in_ln_b], axis=0)                    # (8, H) f32

    sb = _single_buffer_supported()
    cs = functools.partial(_const_spec, single_buffer=sb)
    in_specs = [
        pl.BlockSpec((bt, S, H), lambda b: (b, 0, 0)),    # x
        pl.BlockSpec((bt, 1, S), lambda b: (b, 0, 0)),    # additive key-mask bias
        cs((H, 3 * H)), cs((1, 3 * H)),                   # fused QKV weight / bias
        cs((H, H)),                                       # wo
        cs((H, I)), cs((1, I)),                           # w1, b1
        cs((I, H)),                                       # w2
        cs((8, H)),                                       # packed bias / LayerNorm vectors
    ]

    kernel = functools.partial(bert_layer_kernel, num_heads=num_heads,
                               block_b=bt, seq=S, apply_input_ln=apply_input_ln)
    return pl.pallas_call(
        kernel,
        out_shape=jax.ShapeDtypeStruct((B, S, H), jnp.float32),
        grid=(nb,),
        in_specs=in_specs,
        out_specs=pl.BlockSpec((bt, S, H), lambda b: (b, 0, 0)),
        # f32 ctx scratch: sub-tile-safe stores at small S; cast to bf16 once for wo.
        scratch_shapes=[pltpu.VMEM((bt, S, H), jnp.float32)],
        compiler_params=pltpu.CompilerParams(
            dimension_semantics=("parallel",),
            vmem_limit_bytes=_vmem_limit_bytes()),
    )(x, mask_bias, wqkv, bqkv, lp["wo"], lp["w1"], lp["b1"], lp["w2"], vecs)


def bert_sentence_encoder_forward(params, tokens, mask, lexical_dropout=0.0):
    """Equivalent of BERTSentenceEncoder.forward(tokens, mask)."""
    B, S = tokens.shape
    emb = (params["word_emb"][tokens]
           + params["pos_emb"][:S][None, :, :]
           + params["type_emb"][0][None, None, :])                       # token_type_ids = 0

    # BERT extended attention mask: (1 - mask) * -1e9 added to scores on the key axis
    mask_bias = ((1.0 - mask.astype(jnp.float32)) * -1e9)[:, None, :]    # (B, 1, S)

    h = emb
    for li, lp in enumerate(params["layers"]):
        first = (li == 0)
        h = bert_layer(h, mask_bias, lp, params["num_heads"],
                       apply_input_ln=first,   # embedding LayerNorm fused into layer 0
                       in_ln_g=params["emb_ln_g"] if first else None,
                       in_ln_b=params["emb_ln_b"] if first else None)

    # TODO(synk): training-mode lexical dropout not implemented; with p==0 (the
    # module's `else` branch) or in eval mode it is the identity.
    del lexical_dropout
    return h


# -------------------------- deterministic parameter init ------------------------
def init_bert_params(key, *, vocab_size, max_pos, type_vocab, hidden,
                     intermediate, num_layers, num_heads):
    std = 0.02

    def nrm(k, shape, dtype=jnp.float32):
        return (jax.random.normal(k, shape, jnp.float32) * std).astype(dtype)

    keys = iter(jax.random.split(key, 3 + 6 * num_layers))
    params = {
        "num_heads": num_heads,
        "word_emb": nrm(next(keys), (vocab_size, hidden)),
        "pos_emb": nrm(next(keys), (max_pos, hidden)),
        "type_emb": nrm(next(keys), (type_vocab, hidden)),
        "emb_ln_g": jnp.ones((1, hidden), jnp.float32),
        "emb_ln_b": jnp.zeros((1, hidden), jnp.float32),
        "layers": [],
    }
    bf = jnp.bfloat16  # weight matrices stored in bf16 (MXU-native, half the HBM/VMEM)
    for _ in range(num_layers):
        lp = {
            "wq": nrm(next(keys), (hidden, hidden), bf), "bq": jnp.zeros((1, hidden), jnp.float32),
            "wk": nrm(next(keys), (hidden, hidden), bf), "bk": jnp.zeros((1, hidden), jnp.float32),
            "wv": nrm(next(keys), (hidden, hidden), bf), "bv": jnp.zeros((1, hidden), jnp.float32),
            "wo": nrm(next(keys), (hidden, hidden), bf), "bo": jnp.zeros((1, hidden), jnp.float32),
            "ln1_g": jnp.ones((1, hidden), jnp.float32), "ln1_b": jnp.zeros((1, hidden), jnp.float32),
            "w1": nrm(next(keys), (hidden, intermediate), bf), "b1": jnp.zeros((1, intermediate), jnp.float32),
            "w2": nrm(next(keys), (intermediate, hidden), bf), "b2": jnp.zeros((1, hidden), jnp.float32),
            "ln2_g": jnp.ones((1, hidden), jnp.float32), "ln2_b": jnp.zeros((1, hidden), jnp.float32),
        }
        params["layers"].append(lp)
    return params


# ------------------------------- pure-JAX reference ------------------------------
def ref_forward(params, tokens, mask):
    B, S = tokens.shape
    H = params["word_emb"].shape[1]
    nh = params["num_heads"]
    dh = H // nh
    scale = 1.0 / math.sqrt(dh)
    emb = (params["word_emb"][tokens]
           + params["pos_emb"][:S][None, :, :]
           + params["type_emb"][0][None, None, :])
    h = _layernorm(emb, params["emb_ln_g"], params["emb_ln_b"])
    bias = ((1.0 - mask.astype(jnp.float32)) * -1e9)[:, None, None, :]  # (B,1,1,S)
    for p in params["layers"]:
        q = _proj(h, p["wq"], p["bq"]) * scale
        k = _proj(h, p["wk"], p["bk"])
        v = _proj(h, p["wv"], p["bv"])
        qh = q.reshape(B, S, nh, dh).astype(jnp.bfloat16)
        kh = k.reshape(B, S, nh, dh).astype(jnp.bfloat16)
        vh = v.reshape(B, S, nh, dh).astype(jnp.bfloat16)
        s = jnp.einsum("bqnd,bknd->bnqk", qh, kh,
                       preferred_element_type=jnp.float32) + bias
        pa = _softmax_ref(s)
        ctx = jnp.einsum("bnqk,bknd->bqnd", pa.astype(jnp.bfloat16), vh,
                         preferred_element_type=jnp.float32).reshape(B, S, H)
        attn = _proj(ctx, p["wo"], p["bo"])
        y = _layernorm(h + attn, p["ln1_g"], p["ln1_b"])
        ffn = _proj(_gelu(_proj(y, p["w1"], p["b1"])), p["w2"], p["b2"])
        h = _layernorm(y + ffn, p["ln2_g"], p["ln2_b"])
    return h


# -------------------------------------- main -------------------------------------
if __name__ == "__main__":
    B, S = 2, 8                 # batch, sequence length
    H, I = 32, 64               # hidden, intermediate
    NH, L = 4, 2                # heads, layers
    VOCAB, MAXPOS, TYPES = 30, 16, 2

    key = jax.random.PRNGKey(0)
    kp, kt = jax.random.split(key)
    params = init_bert_params(kp, vocab_size=VOCAB, max_pos=MAXPOS, type_vocab=TYPES,
                              hidden=H, intermediate=I, num_layers=L, num_heads=NH)

    tokens = jax.random.randint(kt, (B, S), 0, VOCAB, dtype=jnp.int32)
    mask = jnp.array([[1, 1, 1, 1, 1, 1, 1, 1],
                      [1, 1, 1, 1, 1, 0, 0, 0]], dtype=jnp.int32)

    out = bert_sentence_encoder_forward(params, tokens, mask, lexical_dropout=0.0)
    out = jax.block_until_ready(out)

    ref = ref_forward(params, tokens, mask)
    assert out.shape == (B, S, H) and out.dtype == jnp.float32
    assert jnp.allclose(out, ref, atol=1e-2, rtol=1e-2), "mismatch vs pure-JAX reference"
    print("KERNEL_OK")
</pallas_src>

<mosaic_0001>
module attributes {stable_mosaic.version = 11 : i64} {
  func.func @probe_kernel(%arg0: i32, %arg1: memref<8x128xf32, #tpu.memory_space<vmem>>, %arg2: memref<8x128xf32, #tpu.memory_space<vmem>>) attributes {dimension_semantics = [#tpu.dimension_semantics<arbitrary>], iteration_bounds = array<i64: 1>, scalar_prefetch = 0 : i64, scratch_operands = 0 : i64, tpu.core_type = #tpu.core_type<tc>, window_params = [{pipeline_mode = #tpu.pipeline_mode<synchronous>, transform_indices = @transform_0, window_bounds = array<i64: 8, 128>}, {pipeline_mode = #tpu.pipeline_mode<synchronous>, transform_indices = @transform_1, window_bounds = array<i64: 8, 128>}]} {
    %c0 = arith.constant 0 : index
    %c0_0 = arith.constant 0 : index
    %0 = vector.load %arg1[%c0, %c0_0] : memref<8x128xf32, #tpu.memory_space<vmem>>, vector<8x128xf32>
    %cst = arith.constant 1.000000e+00 : f32
    %1 = vector.broadcast %cst : f32 to vector<8x128xf32>
    %2 = arith.addf %0, %1 : vector<8x128xf32>
    %c0_1 = arith.constant 0 : index
    %c0_2 = arith.constant 0 : index
    %3 = vector.load %arg2[%c0_1, %c0_2] : memref<8x128xf32, #tpu.memory_space<vmem>>, vector<8x128xf32>
    tpu.vector_store %arg2[%c0_1, %c0_2], %2 {strides = array<i32>} : memref<8x128xf32, #tpu.memory_space<vmem>>, vector<8x128xf32>,
    return
  }
  func.func @transform_0(%arg0: i32) -> (i32, i32) {
    %c0_i32 = arith.constant 0 : i32
    %c0_i32_0 = arith.constant 0 : i32
    %c0_i32_1 = arith.constant 0 : i32
    return %c0_i32, %c0_i32_0 : i32, i32
  }
  func.func @transform_1(%arg0: i32) -> (i32, i32) {
    %c0_i32 = arith.constant 0 : i32
    %c0_i32_0 = arith.constant 0 : i32
    %c0_i32_1 = arith.constant 0 : i32
    return %c0_i32, %c0_i32_0 : i32, i32
  }
}

module attributes {stable_mosaic.version = 11 : i64} {
  func.func @bert_layer_kernel(%arg0: i32, %arg1: memref<1x8x32xf32, #tpu.memory_space<vmem>>, %arg2: memref<1x1x8xf32, #tpu.memory_space<vmem>>, %arg3: memref<32x96xbf16, #tpu.memory_space<vmem>>, %arg4: memref<1x96xf32, #tpu.memory_space<vmem>>, %arg5: memref<32x32xbf16, #tpu.memory_space<vmem>>, %arg6: memref<32x64xbf16, #tpu.memory_space<vmem>>, %arg7: memref<1x64xf32, #tpu.memory_space<vmem>>, %arg8: memref<64x32xbf16, #tpu.memory_space<vmem>>, %arg9: memref<8x32xf32, #tpu.memory_space<vmem>>, %arg10: memref<1x8x32xf32, #tpu.memory_space<vmem>>, %arg11: memref<1x8x32xf32, #tpu.memory_space<vmem>>) attributes {dimension_semantics = [#tpu.dimension_semantics<parallel>], iteration_bounds = array<i64: 2>, scalar_prefetch = 0 : i64, scratch_operands = 1 : i64, tpu.core_type = #tpu.core_type<tc>, window_params = [{transform_indices = @transform_0, window_bounds = array<i64: 1, 8, 32>}, {transform_indices = @transform_1, window_bounds = array<i64: 1, 1, 8>}, {pipeline_mode = #tpu.pipeline_mode<synchronous>, transform_indices = @transform_2, window_bounds = array<i64: 32, 96>}, {pipeline_mode = #tpu.pipeline_mode<synchronous>, transform_indices = @transform_3, window_bounds = array<i64: 1, 96>}, {pipeline_mode = #tpu.pipeline_mode<synchronous>, transform_indices = @transform_4, window_bounds = array<i64: 32, 32>}, {pipeline_mode = #tpu.pipeline_mode<synchronous>, transform_indices = @transform_5, window_bounds = array<i64: 32, 64>}, {pipeline_mode = #tpu.pipeline_mode<synchronous>, transform_indices = @transform_6, window_bounds = array<i64: 1, 64>}, {pipeline_mode = #tpu.pipeline_mode<synchronous>, transform_indices = @transform_7, window_bounds = array<i64: 64, 32>}, {pipeline_mode = #tpu.pipeline_mode<synchronous>, transform_indices = @transform_8, window_bounds = array<i64: 8, 32>}, {transform_indices = @transform_9, window_bounds = array<i64: 1, 8, 32>}]} {
    %c0 = arith.constant 0 : index
    %c0_0 = arith.constant 0 : index
    %c0_1 = arith.constant 0 : index
    %0 = vector.load %arg1[%c0, %c0_0, %c0_1] : memref<1x8x32xf32, #tpu.memory_space<vmem>>, vector<1x8x32xf32>
    %1 = vector.shape_cast %0 : vector<1x8x32xf32> to vector<8x32xf32>
    %c6 = arith.constant 6 : index
    %c0_2 = arith.constant 0 : index
    %2 = vector.load %arg9[%c6, %c0_2] : memref<8x32xf32, #tpu.memory_space<vmem>>, vector<1x32xf32>
    %c7 = arith.constant 7 : index
    %c0_3 = arith.constant 0 : index
    %3 = vector.load %arg9[%c7, %c0_3] : memref<8x32xf32, #tpu.memory_space<vmem>>, vector<1x32xf32>
    %cst = arith.constant dense<0.000000e+00> : vector<8xf32>
    %4 = vector.multi_reduction <add>, %1, %cst [1] : vector<8x32xf32> to vector<8xf32>
    %5 = vector.shape_cast %4 : vector<8xf32> to vector<8x1xf32>
    %cst_4 = arith.constant 3.200000e+01 : f32
    %6 = vector.broadcast %cst_4 : f32 to vector<8x1xf32>
    %7 = arith.divf %5, %6 : vector<8x1xf32>
    %8 = vector.broadcast %7 : vector<8x1xf32> to vector<8x32xf32>
    %9 = arith.subf %1, %8 : vector<8x32xf32>
    %10 = arith.mulf %9, %9 : vector<8x32xf32>
    %cst_5 = arith.constant dense<0.000000e+00> : vector<8xf32>
    %11 = vector.multi_reduction <add>, %10, %cst_5 [1] : vector<8x32xf32> to vector<8xf32>
    %12 = vector.shape_cast %11 : vector<8xf32> to vector<8x1xf32>
    %cst_6 = arith.constant 3.200000e+01 : f32
    %13 = vector.broadcast %cst_6 : f32 to vector<8x1xf32>
    %14 = arith.divf %12, %13 : vector<8x1xf32>
    %15 = vector.broadcast %7 : vector<8x1xf32> to vector<8x32xf32>
    %16 = arith.subf %1, %15 : vector<8x32xf32>
    %cst_7 = arith.constant 9.99999996E-13 : f32
    %17 = vector.broadcast %cst_7 : f32 to vector<8x1xf32>
    %18 = arith.addf %14, %17 : vector<8x1xf32>
    %19 = math.rsqrt %18 : vector<8x1xf32>
    %20 = vector.broadcast %19 : vector<8x1xf32> to vector<8x32xf32>
    %21 = arith.mulf %16, %20 : vector<8x32xf32>
    %22 = vector.broadcast %2 : vector<1x32xf32> to vector<8x32xf32>
    %23 = arith.mulf %21, %22 : vector<8x32xf32>
    %24 = vector.broadcast %3 : vector<1x32xf32> to vector<8x32xf32>
    %25 = arith.addf %23, %24 : vector<8x32xf32>
    %26 = arith.truncf %25 : vector<8x32xf32> to vector<8x32xbf16>
    %c0_8 = arith.constant 0 : index
    %c0_9 = arith.constant 0 : index
    %27 = vector.load %arg3[%c0_8, %c0_9] : memref<32x96xbf16, #tpu.memory_space<vmem>>, vector<32x96xbf16>
    %cst_10 = arith.constant dense<0.000000e+00> : vector<8x96xf32>
    %28 = tpu.matmul %26, %27, %cst_10 {dimension_numbers = #tpu.dot_dimension_numbers<[1], [0], [0], [1], [0, 0, 1, 1], [], []>} : vector<8x32xbf16>, vector<32x96xbf16>, vector<8x96xf32> -> vector<8x96xf32>
    %c0_11 = arith.constant 0 : index
    %c0_12 = arith.constant 0 : index
    %29 = vector.load %arg4[%c0_11, %c0_12] : memref<1x96xf32, #tpu.memory_space<vmem>>, vector<1x96xf32>
    %30 = vector.broadcast %29 : vector<1x96xf32> to vector<8x96xf32>
    %31 = arith.addf %28, %30 : vector<8x96xf32>
    %32 = vector.extract_strided_slice %31 {offsets = [0, 0], sizes = [8, 32], strides = [1, 1]} : vector<8x96xf32> to vector<8x32xf32>
    %cst_13 = arith.constant 0.353553385 : f32
    %33 = vector.broadcast %cst_13 : f32 to vector<8x32xf32>
    %34 = arith.mulf %32, %33 : vector<8x32xf32>
    %35 = vector.extract_strided_slice %31 {offsets = [0, 32], sizes = [8, 32], strides = [1, 1]} : vector<8x96xf32> to vector<8x32xf32>
    %36 = vector.extract_strided_slice %31 {offsets = [0, 64], sizes = [8, 32], strides = [1, 1]} : vector<8x96xf32> to vector<8x32xf32>
    %37 = arith.truncf %34 : vector<8x32xf32> to vector<8x32xbf16>
    %38 = arith.truncf %35 : vector<8x32xf32> to vector<8x32xbf16>
    %39 = arith.truncf %36 : vector<8x32xf32> to vector<8x32xbf16>
    %c0_14 = arith.constant 0 : index
    %c0_15 = arith.constant 0 : index
    %c0_16 = arith.constant 0 : index
    %40 = vector.load %arg2[%c0_14, %c0_15, %c0_16] : memref<1x1x8xf32, #tpu.memory_space<vmem>>, vector<1x1x8xf32>
    %41 = vector.shape_cast %40 : vector<1x1x8xf32> to vector<1x8xf32>
    %42 = vector.extract_strided_slice %37 {offsets = [0, 0], sizes = [8, 8], strides = [1, 1]} : vector<8x32xbf16> to vector<8x8xbf16>
    %43 = vector.extract_strided_slice %38 {offsets = [0, 0], sizes = [8, 8], strides = [1, 1]} : vector<8x32xbf16> to vector<8x8xbf16>
    %cst_17 = arith.constant dense<0.000000e+00> : vector<8x8xf32>
    %44 = tpu.matmul %42, %43, %cst_17 {dimension_numbers = #tpu.dot_dimension_numbers<[1], [1], [0], [0], [0, 0, 1, 0], [], []>} : vector<8x8xbf16>, vector<8x8xbf16>, vector<8x8xf32> -> vector<8x8xf32>
    %45 = vector.broadcast %41 : vector<1x8xf32> to vector<8x8xf32>
    %46 = arith.addf %44, %45 : vector<8x8xf32>
    %cst_18 = arith.constant dense<0xFF800000> : vector<8xf32>
    %47 = vector.multi_reduction <maximumf>, %46, %cst_18 [1] : vector<8x8xf32> to vector<8xf32>
    %48 = vector.shape_cast %47 : vector<8xf32> to vector<8x1xf32>
    %49 = vector.broadcast %48 : vector<8x1xf32> to vector<8x8xf32>
    %50 = arith.subf %46, %49 : vector<8x8xf32>
    %51 = math.exp %50 : vector<8x8xf32>
    %cst_19 = arith.constant dense<0.000000e+00> : vector<8xf32>
    %52 = vector.multi_reduction <add>, %51, %cst_19 [1] : vector<8x8xf32> to vector<8xf32>
    %53 = vector.shape_cast %52 : vector<8xf32> to vector<8x1xf32>
    %54 = tpu.reciprocal %53 {approx = true} : vector<8x1xf32> -> vector<8x1xf32>
    %55 = vector.broadcast %54 : vector<8x1xf32> to vector<8x8xf32>
    %56 = arith.mulf %51, %55 : vector<8x8xf32>
    %57 = arith.truncf %56 : vector<8x8xf32> to vector<8x8xbf16>
    %58 = vector.extract_strided_slice %39 {offsets = [0, 0], sizes = [8, 8], strides = [1, 1]} : vector<8x32xbf16> to vector<8x8xbf16>
    %cst_20 = arith.constant dense<0.000000e+00> : vector<8x8xf32>
    %59 = tpu.matmul %57, %58, %cst_20 {dimension_numbers = #tpu.dot_dimension_numbers<[1], [0], [0], [1], [0, 0, 1, 1], [], []>} : vector<8x8xbf16>, vector<8x8xbf16>, vector<8x8xf32> -> vector<8x8xf32>
    %60 = vector.extract_strided_slice %37 {offsets = [0, 8], sizes = [8, 8], strides = [1, 1]} : vector<8x32xbf16> to vector<8x8xbf16>
    %61 = vector.extract_strided_slice %38 {offsets = [0, 8], sizes = [8, 8], strides = [1, 1]} : vector<8x32xbf16> to vector<8x8xbf16>
    %cst_21 = arith.constant dense<0.000000e+00> : vector<8x8xf32>
    %62 = tpu.matmul %60, %61, %cst_21 {dimension_numbers = #tpu.dot_dimension_numbers<[1], [1], [0], [0], [0, 0, 1, 0], [], []>} : vector<8x8xbf16>, vector<8x8xbf16>, vector<8x8xf32> -> vector<8x8xf32>
    %63 = vector.broadcast %41 : vector<1x8xf32> to vector<8x8xf32>
    %64 = arith.addf %62, %63 : vector<8x8xf32>
    %cst_22 = arith.constant dense<0xFF800000> : vector<8xf32>
    %65 = vector.multi_reduction <maximumf>, %64, %cst_22 [1] : vector<8x8xf32> to vector<8xf32>
    %66 = vector.shape_cast %65 : vector<8xf32> to vector<8x1xf32>
    %67 = vector.broadcast %66 : vector<8x1xf32> to vector<8x8xf32>
    %68 = arith.subf %64, %67 : vector<8x8xf32>
    %69 = math.exp %68 : vector<8x8xf32>
    %cst_23 = arith.constant dense<0.000000e+00> : vector<8xf32>
    %70 = vector.multi_reduction <add>, %69, %cst_23 [1] : vector<8x8xf32> to vector<8xf32>
    %71 = vector.shape_cast %70 : vector<8xf32> to vector<8x1xf32>
    %72 = tpu.reciprocal %71 {approx = true} : vector<8x1xf32> -> vector<8x1xf32>
    %73 = vector.broadcast %72 : vector<8x1xf32> to vector<8x8xf32>
    %74 = arith.mulf %69, %73 : vector<8x8xf32>
    %75 = arith.truncf %74 : vector<8x8xf32> to vector<8x8xbf16>
    %76 = vector.extract_strided_slice %39 {offsets = [0, 8], sizes = [8, 8], strides = [1, 1]} : vector<8x32xbf16> to vector<8x8xbf16>
    %cst_24 = arith.constant dense<0.000000e+00> : vector<8x8xf32>
    %77 = tpu.matmul %75, %76, %cst_24 {dimension_numbers = #tpu.dot_dimension_numbers<[1], [0], [0], [1], [0, 0, 1, 1], [], []>} : vector<8x8xbf16>, vector<8x8xbf16>, vector<8x8xf32> -> vector<8x8xf32>
    %78 = vector.extract_strided_slice %37 {offsets = [0, 16], sizes = [8, 8], strides = [1, 1]} : vector<8x32xbf16> to vector<8x8xbf16>
    %79 = vector.extract_strided_slice %38 {offsets = [0, 16], sizes = [8, 8], strides = [1, 1]} : vector<8x32xbf16> to vector<8x8xbf16>
    %cst_25 = arith.constant dense<0.000000e+00> : vector<8x8xf32>
    %80 = tpu.matmul %78, %79, %cst_25 {dimension_numbers = #tpu.dot_dimension_numbers<[1], [1], [0], [0], [0, 0, 1, 0], [], []>} : vector<8x8xbf16>, vector<8x8xbf16>, vector<8x8xf32> -> vector<8x8xf32>
    %81 = vector.broadcast %41 : vector<1x8xf32> to vector<8x8xf32>
    %82 = arith.addf %80, %81 : vector<8x8xf32>
    %cst_26 = arith.constant dense<0xFF800000> : vector<8xf32>
    %83 = vector.multi_reduction <maximumf>, %82, %cst_26 [1] : vector<8x8xf32> to vector<8xf32>
    %84 = vector.shape_cast %83 : vector<8xf32> to vector<8x1xf32>
    %85 = vector.broadcast %84 : vector<8x1xf32> to vector<8x8xf32>
    %86 = arith.subf %82, %85 : vector<8x8xf32>
    %87 = math.exp %86 : vector<8x8xf32>
    %cst_27 = arith.constant dense<0.000000e+00> : vector<8xf32>
    %88 = vector.multi_reduction <add>, %87, %cst_27 [1] : vector<8x8xf32> to vector<8xf32>
    %89 = vector.shape_cast %88 : vector<8xf32> to vector<8x1xf32>
    %90 = tpu.reciprocal %89 {approx = true} : vector<8x1xf32> -> vector<8x1xf32>
    %91 = vector.broadcast %90 : vector<8x1xf32> to vector<8x8xf32>
    %92 = arith.mulf %87, %91 : vector<8x8xf32>
    %93 = arith.truncf %92 : vector<8x8xf32> to vector<8x8xbf16>
    %94 = vector.extract_strided_slice %39 {offsets = [0, 16], sizes = [8, 8], strides = [1, 1]} : vector<8x32xbf16> to vector<8x8xbf16>
    %cst_28 = arith.constant dense<0.000000e+00> : vector<8x8xf32>
    %95 = tpu.matmul %93, %94, %cst_28 {dimension_numbers = #tpu.dot_dimension_numbers<[1], [0], [0], [1], [0, 0, 1, 1], [], []>} : vector<8x8xbf16>, vector<8x8xbf16>, vector<8x8xf32> -> vector<8x8xf32>
    %96 = vector.extract_strided_slice %37 {offsets = [0, 24], sizes = [8, 8], strides = [1, 1]} : vector<8x32xbf16> to vector<8x8xbf16>
    %97 = vector.extract_strided_slice %38 {offsets = [0, 24], sizes = [8, 8], strides = [1, 1]} : vector<8x32xbf16> to vector<8x8xbf16>
    %cst_29 = arith.constant dense<0.000000e+00> : vector<8x8xf32>
    %98 = tpu.matmul %96, %97, %cst_29 {dimension_numbers = #tpu.dot_dimension_numbers<[1], [1], [0], [0], [0, 0, 1, 0], [], []>} : vector<8x8xbf16>, vector<8x8xbf16>, vector<8x8xf32> -> vector<8x8xf32>
    %99 = vector.broadcast %41 : vector<1x8xf32> to vector<8x8xf32>
    %100 = arith.addf %98, %99 : vector<8x8xf32>
    %cst_30 = arith.constant dense<0xFF800000> : vector<8xf32>
    %101 = vector.multi_reduction <maximumf>, %100, %cst_30 [1] : vector<8x8xf32> to vector<8xf32>
    %102 = vector.shape_cast %101 : vector<8xf32> to vector<8x1xf32>
    %103 = vector.broadcast %102 : vector<8x1xf32> to vector<8x8xf32>
    %104 = arith.subf %100, %103 : vector<8x8xf32>
    %105 = math.exp %104 : vector<8x8xf32>
    %cst_31 = arith.constant dense<0.000000e+00> : vector<8xf32>
    %106 = vector.multi_reduction <add>, %105, %cst_31 [1] : vector<8x8xf32> to vector<8xf32>
    %107 = vector.shape_cast %106 : vector<8xf32> to vector<8x1xf32>
    %108 = tpu.reciprocal %107 {approx = true} : vector<8x1xf32> -> vector<8x1xf32>
    %109 = vector.broadcast %108 : vector<8x1xf32> to vector<8x8xf32>
    %110 = arith.mulf %105, %109 : vector<8x8xf32>
    %111 = arith.truncf %110 : vector<8x8xf32> to vector<8x8xbf16>
    %112 = vector.extract_strided_slice %39 {offsets = [0, 24], sizes = [8, 8], strides = [1, 1]} : vector<8x32xbf16> to vector<8x8xbf16>
    %cst_32 = arith.constant dense<0.000000e+00> : vector<8x8xf32>
    %113 = tpu.matmul %111, %112, %cst_32 {dimension_numbers = #tpu.dot_dimension_numbers<[1], [0], [0], [1], [0, 0, 1, 1], [], []>} : vector<8x8xbf16>, vector<8x8xbf16>, vector<8x8xf32> -> vector<8x8xf32>
    %114 = tpu.concatenate %59, %77, %95, %113 in 1 : vector<8x8xf32>, vector<8x8xf32>, vector<8x8xf32>, vector<8x8xf32> -> vector<8x32xf32>
    %c0_33 = arith.constant 0 : index
    %c0_34 = arith.constant 0 : index
    %c0_35 = arith.constant 0 : index
    %115 = vector.load %arg11[%c0_33, %c0_34, %c0_35] : memref<1x8x32xf32, #tpu.memory_space<vmem>>, vector<1x8x32xf32>
    %116 = vector.shape_cast %115 : vector<1x8x32xf32> to vector<8x32xf32>
    %117 = vector.shape_cast %114 : vector<8x32xf32> to vector<1x8x32xf32>
    tpu.vector_store %arg11[%c0_33, %c0_34, %c0_35], %117 {strides = array<i32>} : memref<1x8x32xf32, #tpu.memory_space<vmem>>, vector<1x8x32xf32>,
    %c0_36 = arith.constant 0 : index
    %c0_37 = arith.constant 0 : index
    %c0_38 = arith.constant 0 : index
    %118 = vector.load %arg11[%c0_36, %c0_37, %c0_38] : memref<1x8x32xf32, #tpu.memory_space<vmem>>, vector<1x8x32xf32>
    %119 = vector.shape_cast %118 : vector<1x8x32xf32> to vector<8x32xf32>
    %120 = arith.truncf %119 : vector<8x32xf32> to vector<8x32xbf16>
    %c0_39 = arith.constant 0 : index
    %c0_40 = arith.constant 0 : index
    %121 = vector.load %arg5[%c0_39, %c0_40] : memref<32x32xbf16, #tpu.memory_space<vmem>>, vector<32x32xbf16>
    %cst_41 = arith.constant dense<0.000000e+00> : vector<8x32xf32>
    %122 = tpu.matmul %120, %121, %cst_41 {dimension_numbers = #tpu.dot_dimension_numbers<[1], [0], [0], [1], [0, 0, 1, 1], [], []>} : vector<8x32xbf16>, vector<32x32xbf16>, vector<8x32xf32> -> vector<8x32xf32>
    %c0_42 = arith.constant 0 : index
    %c0_43 = arith.constant 0 : index
    %123 = vector.load %arg9[%c0_42, %c0_43] : memref<8x32xf32, #tpu.memory_space<vmem>>, vector<1x32xf32>
    %124 = vector.broadcast %123 : vector<1x32xf32> to vector<8x32xf32>
    %125 = arith.addf %122, %124 : vector<8x32xf32>
    %126 = arith.addf %25, %125 : vector<8x32xf32>
    %c1 = arith.constant 1 : index
    %c0_44 = arith.constant 0 : index
    %127 = vector.load %arg9[%c1, %c0_44] : memref<8x32xf32, #tpu.memory_space<vmem>>, vector<1x32xf32>
    %c2 = arith.constant 2 : index
    %c0_45 = arith.constant 0 : index
    %128 = vector.load %arg9[%c2, %c0_45] : memref<8x32xf32, #tpu.memory_space<vmem>>, vector<1x32xf32>
    %cst_46 = arith.constant dense<0.000000e+00> : vector<8xf32>
    %129 = vector.multi_reduction <add>, %126, %cst_46 [1] : vector<8x32xf32> to vector<8xf32>
    %130 = vector.shape_cast %129 : vector<8xf32> to vector<8x1xf32>
    %cst_47 = arith.constant 3.200000e+01 : f32
    %131 = vector.broadcast %cst_47 : f32 to vector<8x1xf32>
    %132 = arith.divf %130, %131 : vector<8x1xf32>
    %133 = vector.broadcast %132 : vector<8x1xf32> to vector<8x32xf32>
    %134 = arith.subf %126, %133 : vector<8x32xf32>
    %135 = arith.mulf %134, %134 : vector<8x32xf32>
    %cst_48 = arith.constant dense<0.000000e+00> : vector<8xf32>
    %136 = vector.multi_reduction <add>, %135, %cst_48 [1] : vector<8x32xf32> to vector<8xf32>
    %137 = vector.shape_cast %136 : vector<8xf32> to vector<8x1xf32>
    %cst_49 = arith.constant 3.200000e+01 : f32
    %138 = vector.broadcast %cst_49 : f32 to vector<8x1xf32>
    %139 = arith.divf %137, %138 : vector<8x1xf32>
    %140 = vector.broadcast %132 : vector<8x1xf32> to vector<8x32xf32>
    %141 = arith.subf %126, %140 : vector<8x32xf32>
    %cst_50 = arith.constant 9.99999996E-13 : f32
    %142 = vector.broadcast %cst_50 : f32 to vector<8x1xf32>
    %143 = arith.addf %139, %142 : vector<8x1xf32>
    %144 = math.rsqrt %143 : vector<8x1xf32>
    %145 = vector.broadcast %144 : vector<8x1xf32> to vector<8x32xf32>
    %146 = arith.mulf %141, %145 : vector<8x32xf32>
    %147 = vector.broadcast %127 : vector<1x32xf32> to vector<8x32xf32>
    %148 = arith.mulf %146, %147 : vector<8x32xf32>
    %149 = vector.broadcast %128 : vector<1x32xf32> to vector<8x32xf32>
    %150 = arith.addf %148, %149 : vector<8x32xf32>
    %151 = arith.truncf %150 : vector<8x32xf32> to vector<8x32xbf16>
    %c0_51 = arith.constant 0 : index
    %c0_52 = arith.constant 0 : index
    %152 = vector.load %arg6[%c0_51, %c0_52] : memref<32x64xbf16, #tpu.memory_space<vmem>>, vector<32x64xbf16>
    %cst_53 = arith.constant dense<0.000000e+00> : vector<8x64xf32>
    %153 = tpu.matmul %151, %152, %cst_53 {dimension_numbers = #tpu.dot_dimension_numbers<[1], [0], [0], [1], [0, 0, 1, 1], [], []>} : vector<8x32xbf16>, vector<32x64xbf16>, vector<8x64xf32> -> vector<8x64xf32>
    %c0_54 = arith.constant 0 : index
    %c0_55 = arith.constant 0 : index
    %154 = vector.load %arg7[%c0_54, %c0_55] : memref<1x64xf32, #tpu.memory_space<vmem>>, vector<1x64xf32>
    %155 = vector.broadcast %154 : vector<1x64xf32> to vector<8x64xf32>
    %156 = arith.addf %153, %155 : vector<8x64xf32>
    %cst_56 = arith.constant 5.000000e-01 : f32
    %157 = vector.broadcast %cst_56 : f32 to vector<8x64xf32>
    %158 = arith.mulf %157, %156 : vector<8x64xf32>
    %cst_57 = arith.constant 4.471500e-02 : f32
    %159 = vector.broadcast %cst_57 : f32 to vector<8x64xf32>
    %160 = arith.mulf %159, %156 : vector<8x64xf32>
    %161 = arith.mulf %160, %156 : vector<8x64xf32>
    %162 = arith.mulf %161, %156 : vector<8x64xf32>
    %163 = arith.addf %156, %162 : vector<8x64xf32>
    %cst_58 = arith.constant 0.797884583 : f32
    %164 = vector.broadcast %cst_58 : f32 to vector<8x64xf32>
    %165 = arith.mulf %164, %163 : vector<8x64xf32>
    %166 = math.tanh %165 : vector<8x64xf32>
    %cst_59 = arith.constant 1.000000e+00 : f32
    %167 = vector.broadcast %cst_59 : f32 to vector<8x64xf32>
    %168 = arith.addf %167, %166 : vector<8x64xf32>
    %169 = arith.mulf %158, %168 : vector<8x64xf32>
    %170 = arith.truncf %169 : vector<8x64xf32> to vector<8x64xbf16>
    %c0_60 = arith.constant 0 : index
    %c0_61 = arith.constant 0 : index
    %171 = vector.load %arg8[%c0_60, %c0_61] : memref<64x32xbf16, #tpu.memory_space<vmem>>, vector<64x32xbf16>
    %cst_62 = arith.constant dense<0.000000e+00> : vector<8x32xf32>
    %172 = tpu.matmul %170, %171, %cst_62 {dimension_numbers = #tpu.dot_dimension_numbers<[1], [0], [0], [1], [0, 0, 1, 1], [], []>} : vector<8x64xbf16>, vector<64x32xbf16>, vector<8x32xf32> -> vector<8x32xf32>
    %c3 = arith.constant 3 : index
    %c0_63 = arith.constant 0 : index
    %173 = vector.load %arg9[%c3, %c0_63] : memref<8x32xf32, #tpu.memory_space<vmem>>, vector<1x32xf32>
    %174 = vector.broadcast %173 : vector<1x32xf32> to vector<8x32xf32>
    %175 = arith.addf %172, %174 : vector<8x32xf32>
    %176 = arith.addf %150, %175 : vector<8x32xf32>
    %c4 = arith.constant 4 : index
    %c0_64 = arith.constant 0 : index
    %177 = vector.load %arg9[%c4, %c0_64] : memref<8x32xf32, #tpu.memory_space<vmem>>, vector<1x32xf32>
    %c5 = arith.constant 5 : index
    %c0_65 = arith.constant 0 : index
    %178 = vector.load %arg9[%c5, %c0_65] : memref<8x32xf32, #tpu.memory_space<vmem>>, vector<1x32xf32>
    %cst_66 = arith.constant dense<0.000000e+00> : vector<8xf32>
    %179 = vector.multi_reduction <add>, %176, %cst_66 [1] : vector<8x32xf32> to vector<8xf32>
    %180 = vector.shape_cast %179 : vector<8xf32> to vector<8x1xf32>
    %cst_67 = arith.constant 3.200000e+01 : f32
    %181 = vector.broadcast %cst_67 : f32 to vector<8x1xf32>
    %182 = arith.divf %180, %181 : vector<8x1xf32>
    %183 = vector.broadcast %182 : vector<8x1xf32> to vector<8x32xf32>
    %184 = arith.subf %176, %183 : vector<8x32xf32>
    %185 = arith.mulf %184, %184 : vector<8x32xf32>
    %cst_68 = arith.constant dense<0.000000e+00> : vector<8xf32>
    %186 = vector.multi_reduction <add>, %185, %cst_68 [1] : vector<8x32xf32> to vector<8xf32>
    %187 = vector.shape_cast %186 : vector<8xf32> to vector<8x1xf32>
    %cst_69 = arith.constant 3.200000e+01 : f32
    %188 = vector.broadcast %cst_69 : f32 to vector<8x1xf32>
    %189 = arith.divf %187, %188 : vector<8x1xf32>
    %190 = vector.broadcast %182 : vector<8x1xf32> to vector<8x32xf32>
    %191 = arith.subf %176, %190 : vector<8x32xf32>
    %cst_70 = arith.constant 9.99999996E-13 : f32
    %192 = vector.broadcast %cst_70 : f32 to vector<8x1xf32>
    %193 = arith.addf %189, %192 : vector<8x1xf32>
    %194 = math.rsqrt %193 : vector<8x1xf32>
    %195 = vector.broadcast %194 : vector<8x1xf32> to vector<8x32xf32>
    %196 = arith.mulf %191, %195 : vector<8x32xf32>
    %197 = vector.broadcast %177 : vector<1x32xf32> to vector<8x32xf32>
    %198 = arith.mulf %196, %197 : vector<8x32xf32>
    %199 = vector.broadcast %178 : vector<1x32xf32> to vector<8x32xf32>
    %200 = arith.addf %198, %199 : vector<8x32xf32>
    %201 = vector.shape_cast %200 : vector<8x32xf32> to vector<1x8x32xf32>
    %c0_71 = arith.constant 0 : index
    %c0_72 = arith.constant 0 : index
    %c0_73 = arith.constant 0 : index
    %202 = vector.load %arg10[%c0_71, %c0_72, %c0_73] : memref<1x8x32xf32, #tpu.memory_space<vmem>>, vector<1x8x32xf32>
    tpu.vector_store %arg10[%c0_71, %c0_72, %c0_73], %201 {strides = array<i32>} : memref<1x8x32xf32, #tpu.memory_space<vmem>>, vector<1x8x32xf32>,
    return
  }
  func.func @transform_0(%arg0: i32) -> (i32, i32, i32) {
    %c0_i32 = arith.constant 0 : i32
    %c0_i32_0 = arith.constant 0 : i32
    %c0_i32_1 = arith.constant 0 : i32
    return %arg0, %c0_i32, %c0_i32_0 : i32, i32, i32
  }
  func.func @transform_1(%arg0: i32) -> (i32, i32, i32) {
    %c0_i32 = arith.constant 0 : i32
    %c0_i32_0 = arith.constant 0 : i32
    %c0_i32_1 = arith.constant 0 : i32
    return %arg0, %c0_i32, %c0_i32_0 : i32, i32, i32
  }
  func.func @transform_2(%arg0: i32) -> (i32, i32) {
    %c0_i32 = arith.constant 0 : i32
    %c0_i32_0 = arith.constant 0 : i32
    %c0_i32_1 = arith.constant 0 : i32
    return %c0_i32, %c0_i32_0 : i32, i32
  }
  func.func @transform_3(%arg0: i32) -> (i32, i32) {
    %c0_i32 = arith.constant 0 : i32
    %c0_i32_0 = arith.constant 0 : i32
    %c0_i32_1 = arith.constant 0 : i32
    return %c0_i32, %c0_i32_0 : i32, i32
  }
  func.func @transform_4(%arg0: i32) -> (i32, i32) {
    %c0_i32 = arith.constant 0 : i32
    %c0_i32_0 = arith.constant 0 : i32
    %c0_i32_1 = arith.constant 0 : i32
    return %c0_i32, %c0_i32_0 : i32, i32
  }
  func.func @transform_5(%arg0: i32) -> (i32, i32) {
    %c0_i32 = arith.constant 0 : i32
    %c0_i32_0 = arith.constant 0 : i32
    %c0_i32_1 = arith.constant 0 : i32
    return %c0_i32, %c0_i32_0 : i32, i32
  }
  func.func @transform_6(%arg0: i32) -> (i32, i32) {
    %c0_i32 = arith.constant 0 : i32
    %c0_i32_0 = arith.constant 0 : i32
    %c0_i32_1 = arith.constant 0 : i32
    return %c0_i32, %c0_i32_0 : i32, i32
  }
  func.func @transform_7(%arg0: i32) -> (i32, i32) {
    %c0_i32 = arith.constant 0 : i32
    %c0_i32_0 = arith.constant 0 : i32
    %c0_i32_1 = arith.constant 0 : i32
    return %c0_i32, %c0_i32_0 : i32, i32
  }
  func.func @transform_8(%arg0: i32) -> (i32, i32) {
    %c0_i32 = arith.constant 0 : i32
    %c0_i32_0 = arith.constant 0 : i32
    %c0_i32_1 = arith.constant 0 : i32
    return %c0_i32, %c0_i32_0 : i32, i32
  }
  func.func @transform_9(%arg0: i32) -> (i32, i32, i32) {
    %c0_i32 = arith.constant 0 : i32
    %c0_i32_0 = arith.constant 0 : i32
    %c0_i32_1 = arith.constant 0 : i32
    return %arg0, %c0_i32, %c0_i32_0 : i32, i32, i32
  }
}

</mosaic_0001>

<bundles_post_ra>
// kernel: tpu_custom_call.1
= control target key start
LH: loop header
LB: loop body
LE: loop exit
PB: predicated region body
PF: predicated region fallthrough
CT: control target
= control target key end

     0   :  { %6 = vsyncpa [#allocation3], 0  ;;  %s115_s0 = inlined_call_operand.hbm [shape: f32[8,128], index: 0, kind: input, shape index: {}]   ;;  %s116_s1 = inlined_call_operand.hbm [shape: f32[8,128], index: 1, kind: output, shape index: {}]  }
   0x1   :  { %7 = vsyncpa [#allocation4], 0  ;;  %s13_s8 = sshll.u32 %s115_s0, 4  ;;  %s97_s9 = smov [#allocation2]   ;;  %s14_s8 = int_to_ptr.hbm [resolvable:$true] %s13_s8 }
   0x2   :  { %s15_s10 = sshll.u32 %s97_s9, 4  ;;  %s16_s10 = int_to_ptr.vmem [resolvable:$true] %s15_s10 }
   0x3   :  { %18 = dma.hbm_to_vmem [thread:$0]  %s14_s8, 128, %s16_s10, [#allocation3]  }
   0x4   :  { %93 = dma.done.wait [#allocation3], 128  }
   0x5   :  { %94 = vsyncadd [#allocation3], 4294967168  ;;  %s98_s11 = smov [#allocation5]   ;;  %s33_s15 = sshll.u32 %s116_s1, 4  ;;  %v23_v0 = vld [vmem:[#allocation2] sm:$0xff]  ;;  %s34_s15 = int_to_ptr.hbm [resolvable:$true] %s33_s15 }
   0x6   :  { %s31_s12 = sshll.u32 %s98_s11, 4  ;;  %v24_v1 = vadd.f32 1.0, %v23_v0  ;;  %s32_s12 = int_to_ptr.vmem [resolvable:$true] %s31_s12 }
   0x8   :  { %25 = vst [vmem:[#allocation5] sm:$0xff] %v24_v1 }
   0x9   :  { %36 = dma.vmem_to_hbm [thread:$0]  %s32_s12, 128, %s34_s15, [#allocation4]  }
   0xa   :  { %95 = dma.done.wait [#allocation4], 128  }
   0xb   :  { %96 = vsyncadd [#allocation4], 4294967168 }
   0xc   :  { %41 = vsyncpa [#allocation3], 1 }
   0xd   :  { %42 = vsyncpa [#allocation4], 1 }

// kernel: tpu_custom_call.1
= control target key start
LH: loop header
LB: loop body
LE: loop exit
PB: predicated region body
PF: predicated region fallthrough
CT: control target
= control target key end

     0   :  { %s1700_s0 = inlined_call_operand.vmem [shape: f32[2,8,32], index: 0, kind: input, shape index: {}]   ;;  %s1701_s1 = inlined_call_operand.hbm [shape: f32[2,1,8], index: 1, kind: input, shape index: {}]   ;;  %s1702_s2 = inlined_call_operand.vmem [shape: bf16[32,96], index: 2, kind: input, shape index: {}]   ;;  %s1703_s3 = inlined_call_operand.vmem [shape: f32[1,96], index: 3, kind: input, shape index: {}]   ;;  %s1704_s4 = inlined_call_operand.vmem [shape: bf16[32,32], index: 4, kind: input, shape index: {}]   ;;  %s1705_s5 = inlined_call_operand.hbm [shape: bf16[32,64], index: 5, kind: input, shape index: {}]   ;;  %s1706_s6 = inlined_call_operand.vmem [shape: f32[1,64], index: 6, kind: input, shape index: {}]   ;;  %s1707_s7 = inlined_call_operand.vmem [shape: bf16[64,32], index: 7, kind: input, shape index: {}]   ;;  %s1708_s8 = inlined_call_operand.hbm [shape: f32[8,32], index: 8, kind: input, shape index: {}]   ;;  %s1709_s9 = inlined_call_operand.hbm [shape: f32[2,8,32], index: 9, kind: output, shape index: {}]  }
   0x1   :  { %1710 = sst [smem:[#allocation13_spill]] %s1705_s5 }
   0x2   :  { %1711 = sst [smem:[#allocation14_spill]] %s1708_s8 }
   0x3   :  { %14 = vsyncpa [#allocation4], 0 }
   0x4   :  { %16 = vsyncpa [#allocation4 + $0x1], 0 }
   0x5   :  { %17 = vsyncpa [#allocation7], 0 }
   0x6   :  { %18 = vsyncpa [#allocation5], 0 }
   0x7   :  { %20 = vsyncpa [#allocation5 + $0x1], 0  ;;  %s1458_s30 = smov 0   ;;  %s1460_s10 = smov 0  }
   0x8   :  { %s1462_s11 = smov 0   ;;  %s1464_s12 = smov 0  }
   0x9 LB: > { %s1712_s5 = sld [smem:[#allocation13_spill]]  ;;  %s1482_s16 = sadd.s32 4294967295, %s1387_s12   ;;  %s1387_s12 = sphi %s1464_s12, %s1724_s12   ;;  %s1383_s11 = sphi %s1462_s11, %s1723_s11   ;;  %s1379_s10 = sphi %s1460_s10, %s1722_s10   ;;  %s1375_s30 = sphi %s1458_s30, %s1721_s30  }
   0xa   : > { %p1031_p0 = scmp.ge.s32.totalorder %s1387_s12, 1  ;;  %p73_p1 = scmp.eq.s32.totalorder %s1482_s16, 0 }
   0xb   : > { %p256_p2 = scmp.lt.s32.totalorder %s1387_s12, 3  ;;  %s1389_s18 = smov [#allocation6]  }
   0xc   : > { %s278_s19 = sshll.u32 %s1389_s18, 4  ;;  %s1714_s8 = sld [smem:[#allocation14_spill]]  ;;  %s279_s19 = int_to_ptr.vmem [resolvable:$true] %s278_s19 }
   0xd   : > { %p1487_p3 = pnand %p1031_p0, %p256_p2  ;;  %s1390_s23 = smov [#allocation8]  }
   0xe   : > { %s299_s24 = sshll.u32 %s1390_s23, 4  ;;  %s1391_s25 = smov 64   ;;  %s300_s24 = int_to_ptr.vmem [resolvable:$true] %s299_s24 }
   0xf   : > { %s276_s15 = sshll.u32 %s1712_s5, 4  ;;  %p1118_p4 = pneg %p1487_p3  ;;  %s277_s15 = int_to_ptr.hbm [resolvable:$true] %s276_s15 }
  0x10   : > { %s1392_s26 = smov 4   ;;  %s1030_s27 = sadd.s32 4294967294, %s1387_s12  }
  0x11   : > { %p1119_p6 = pnand %p1118_p4, %p73_p1  ;;  %s1501_s28 = sadd.s32 1, %s1387_s12  }
  0x12   : > { %s297_s22 = sshll.u32 %s1714_s8, 4  ;;  %s56_s29 = ssub.s32 %s1387_s12, %s1501_s28  ;;  %s298_s22 = int_to_ptr.hbm [resolvable:$true] %s297_s22 }
  0x13   : > { %1121 = dma.hbm_to_vmem [thread:$0]  (!%p1119_p6), %s277_s15, 256, %s279_s19, [#allocation7], %s1391_s25, %s1391_s25, %s1392_s26  }
  0x14   : > { %1124 = dma.hbm_to_vmem [thread:$0]  (!%p1119_p6), %s298_s22, 128, %s300_s24, [#allocation7]  }
  0x15   : > { %s59_s13 = sadd.s32 1, %s1383_s11  ;;  %p57_p7 = scmp.eq.s32.totalorder %s56_s29, 0 }
  0x16   : > { %p66_p8 = scmp.ne.s32.totalorder %s1383_s11, %s1379_s10  ;;  %p67_p9 = scmp.eq.s32.totalorder %s1387_s12, 0 }
  0x17   : > { %p72_p10 = scmp.ne.s32.totalorder %s1379_s10, %s1375_s30  ;;  %p243_p13 = scmp.eq.s32.totalorder %s1482_s16, 1 }
  0x18   : > { %s1512_s14 = scalar_select %p57_p7, %s1383_s11, %s59_s13  }
  0x19   : > { %p1514_p11 = por %p67_p9, %p66_p8  ;;  %p1520_p12 = por %p73_p1, %p72_p10 }
  0x1a   : > { %p249_p0 = scmp.eq.s32.totalorder %s1030_s27, 1  ;;  %p1135_p2 = scmp.lt.s32.totalorder %s1387_s12, 2 }
  0x1b   : > { %s317_s19 = sand.u32 1, %s1383_s11   ;;  %p1527_p4 = por %p243_p13, %p66_p8 }
  0x1c   : > { %p1531_p6 = por %p249_p0, %p72_p10  ;;  %s323_s24 = scalar_lea.hbm %s1701_s1, %s1387_s12 }
  0x1d   : > { %s320_s25 = scalar_lea.vmem [#allocation3], %s317_s19  ;;  %s325_s29 = sshll.u32 %s323_s24, 4  ;;  %s326_s29 = int_to_ptr.hbm [resolvable:$true] %s325_s29 }
  0x1e   : > { %s327_s26 = sshll.u32 %s320_s25, 4  ;;  %p1541_p7 = pnand %p1135_p2, %p1514_p11  ;;  %s328_s26 = int_to_ptr.vmem [resolvable:$true] %s327_s26 }
  0x1f   : > { %s318_s13 = scalar_lea.sflag [#allocation4], %s317_s19  ;;  %s1287_s5 = sshra.s32 %s326_s29, 4  ;;  %s1288_s5 = int_to_ptr.hbm [resolvable:$true] %s1287_s5 }
  0x20   : > { %s1289_s8 = scalar_lea.hbm %s1288_s5, 1  ;;  %p1291_p9 = pneg %p1541_p7 }
  0x21   : > { %p1290_p8 = scmp.ne.s32.totalorder %s1288_s5, %s1289_s8  ;;  %s1294_s24 = scalar_lea.hbm %s1701_s1, 2 }
  0x22   : > { %p1295_p11 = scmp.lt.s32.totalorder %s1288_s5, %s1701_s1  ;;  %p1296_p0 = scmp.lt.s32.totalorder %s1294_s24, %s1289_s8 }
  0x23   : > { %p1292_p10 = pnand %p1291_p9, %p1290_p8 }
  0x24   : > { %p1297_p2 = por %p1296_p0, %p1295_p11 }
  0x25   : > { %p1293_p13 = pneg %p1292_p10 }
  0x27   : > { %p1298_p5 = pnand %p1297_p2, %p1293_p13 }
  0x29   : > { %1301 = shalt.err (!%p1298_p5)
}
  0x2a   : > { %1128 = dma.hbm_to_vmem [thread:$0]  (!%p1541_p7), %s326_s29, 16, %s328_s26, %s318_s13  }
  0x2b   : > { %336 = sbr.rel (%p1487_p3) target bundleno = 2217 (0x8a9), region = 56  ;;  %s1558_s19 = sand.u32 (!%p1487_p3), 1, %s1379_s10  }
  0x2c   : > { %s339_s22 = scalar_lea.sflag (!%p1487_p3), [#allocation4], %s1558_s19  ;;  %s341_s23 = scalar_lea.vmem (!%p1487_p3), [#allocation3], %s1558_s19 }
  0x30   : > { %1362 = dma.done.wait (%p1520_p12), %s339_s22, 16  }
  0x31   : > { %1364 = vsyncadd (%p1520_p12), %s339_s22, 4294967280 }
  0x32   : > { %1366 = dma.done.wait (%p73_p1), [#allocation7], 384  }
  0x33   : > { %1368 = vsyncadd (%p73_p1), [#allocation7], 4294966912  ;;  %p390_p3 = scmp.lt.s32.totalorder %s1482_s16, 1  ;;  %vm398_vm0 = vcmask 261120   ;;  %v1393_v2 = vmov 32.0   ;;  %v1097_v14 = vld [vmem:[%s1702_s2 + $0x8] sm:$0xff] }
  0x34   : > { %1201 = vrcp.f32 %v1393_v2  ;;  %462 = vmatpush.bf16.msra.mxu0 %v1097_v14  ;;  %v1096_v15 = vld [vmem:[%s1702_s2] sm:$0xff]  ;;  %s1394_s22 = smov 96   ;;  %s1397_s17 = smov 88   ;;  %vm481_vm5 = vcmask 64512   ;;  %vm518_vm6 = vcmask 1043456   ;;  %vm719_vm7 = vcmask 130048  }
  0x35   : > { %s391_s5 = scalar_select %p390_p3, %s1482_s16, 1  ;;  %v1190_v25 = vld [vmem:[#allocation8 + $0x6] ss:$0 sm:$0xff]  ;;  %v1191_v28 = vld [vmem:[#allocation8 + $0x7] ss:$0 sm:$0xff]  ;;  %vm721_vm8 = vcmask 195584  }
  0x36   : > { %v1192_v32 = vld [vmem:[%s1703_s3] ss:$0 sm:$0xff]  ;;  %s1398_s26 = smov 72   ;;  %s1400_s15 = smov 112   ;;  %vm870_vm12 = vcmask 523264  }
  0x37   : > { %s1039_s8 = sshll.u32 %s391_s5, 3  ;;  %s1395_s5 = smov 104   ;;  %v1193_v54 = vld [vmem:[%s341_s23] ss:$0 sm:$0xff] }
  0x38   : > { %s393_s29 = scalar_lea.vmem %s1700_s0, %s1039_s8  ;;  %463 = vmatpush.bf16.msra.mxu0 %v1096_v15  ;;  %s1396_s8 = smov 120  }
  0x39   : > { %v395_v0 = vld [vmem:[%s393_s29] sm:$0xff]  ;;  %s1399_s29 = smov 80   ;;  %s1401_s23 = smov 64  }
  0x3a   : > { %v399_v1 = vsel %vm398_vm0, %v395_v0, 0.0  ;;  %v1202_v3 = vpop.eup %1201  ;;  %s1402_s27 = smov 56   ;;  %s1403_s13 = smov 40  }
  0x3b   : > { %400 = vadd.xlane.f32.xlu0 %v399_v1  ;;  %v403_v4 = vmul.f32 32.0, %v1202_v3  ;;  %vm407_vm1 = vweird.f32 %v1202_v3  ;;  %s1404_s24 = smov 48   ;;  %s1405_s25 = smov 8  }
  0x3c   : > { %s1406_s18 = smov 24  }
  0x3d   : > { %v404_v5 = vsub.f32 1.0, %v403_v4 }
  0x3f   : > { %v405_v6 = vmul.f32 %v1202_v3, %v404_v5 }
  0x41   : > { %v406_v7 = vadd.f32 %v1202_v3, %v405_v6 }
  0x43   : > { %v1576_v8 = vsel %vm407_vm1, %v1202_v3, %v406_v7 }
  0xae   : > { %v401_v9 = vpop.xlane.xlu0 %400 }
  0xaf   : > { %v409_v10 = vmul.f32 %v1576_v8, %v401_v9 }
  0xb1   : > { %v410_v11 = vsub.f32 %v395_v0, %v409_v10 }
  0xb3   : > { %v411_v12 = vmul.f32 %v410_v11, %v410_v11 }
  0xb5   : > { %v412_v13 = vsel %vm398_vm0, %v411_v12, 0.0 }
  0xb6   : > { %413 = vadd.xlane.f32.xlu0 %v412_v13 }
 0x129   : > { %v414_v16 = vpop.xlane.xlu0 %413 }
 0x12a   : > { %v415_v17 = vmul.f32 %v414_v16, %v1576_v8 }
 0x12c   : > { %v416_v18 = vadd.f32 1e-12, %v415_v17 }
 0x12e   : > { %1203 = vrsqrt.f32 %v416_v18  ;;  %vm423_vm3 = vweird.f32 %v416_v18 }
 0x134   : > { %v1204_v19 = vpop.eup %1203 }
 0x135   : > { %v418_v20 = vmul.f32 %v1204_v19, %v416_v18  ;;  %vm424_vm2 = vweird.f32 %v1204_v19 }
 0x136   : > { %vm425_vm4 = vmor %vm423_vm3, %vm424_vm2 }
 0x137   : > { %v419_v21 = vmul.f32 %v1204_v19, %v418_v20 }
 0x139   : > { %v420_v22 = vmul.f32 0.5, %v419_v21 }
 0x13b   : > { %v421_v23 = vsub.f32 1.5, %v420_v22 }
 0x13d   : > { %v422_v24 = vmul.f32 %v1204_v19, %v421_v23 }
 0x13f   : > { %v426_v26 = vsel %vm425_vm4, %v1204_v19, %v422_v24 }
 0x140   : > { %v427_v27 = vmul.f32 %v426_v26, %v410_v11 }
 0x142   : > { %v429_v29 = vmul.f32 %v1190_v25, %v427_v27 }
 0x144   : > { %v1587_v30 = vadd.f32 %v1191_v28, %v429_v29 }
 0x146   : > { %v432_v31 = vpack.c.bf16 %v1587_v30, %v1587_v30 }
 0x148   : > { %1048 = vmatmul.msk.bf16.vlgmr.msra.gmra.mxu0 %vm398_vm0, %v432_v31 }
 0x1c5   : > { %v465_v33 = vpop.f32.mrf.mxu0 }
 0x1c6   : > { %v466_v34 = vadd.f32 %v1192_v32, %v465_v33 }
 0x1c8   : > { %v469_v35 = vmul.f32 0.35355338, %v466_v34  ;;  %v471_v36 = vpack.c.bf16 %v466_v34, %v466_v34 }
 0x1ca   : > { %v470_v37 = vpack.c.bf16 %v469_v35, %v469_v35  ;;  %v477_v38 = vunpack.c.l.b16 %v471_v36 }
 0x1cc   : > { %v1595_v39 = vpack.c.b16 %v477_v38, %v477_v38  ;;  %v536_v40 = vunpack.c.l.b16 %v470_v37 }
 0x1cd   : > { %v467_v41 = vpop.f32.mrf.mxu0 }
 0x1ce   : > { %479 = vrot.lane.b32.xlu1 %v1595_v39, %s1394_s22  ;;  %v537_v42 = vpack.c.b16 %v536_v40, %v536_v40  ;;  %s1407_s22 = smov 16  }
 0x1d0   : > { %650 = vrot.lane.b32.xlu0 %v537_v42, %s1395_s5  ;;  %538 = vrot.lane.b32.xlu2 %v537_v42, %s1396_s8  ;;  %s1038_s8 = sshll.u32 %s1558_s19, 3  ;;  %s1337_s5 = scalar_lea.hbm %s1709_s9, 16 }
 0x1d6   : > { %540 = vrot.lane.b32.xlu1 %v1595_v39, %s1397_s17  ;;  %s1093_s17 = sshll.u32 %s1482_s16, 3  ;;  %s918_s16 = scalar_lea.sflag [#allocation5], %s1558_s19 }
 0x1d8   : > { %652 = vrot.lane.b32.xlu2 %v1595_v39, %s1398_s26 }
 0x1de   : > { %596 = vrot.lane.b32.xlu1 %v1595_v39, %s1399_s29 }
 0x1e0   : > { %594 = vrot.lane.b32.xlu2 %v537_v42, %s1400_s15  ;;  %s928_s15 = scalar_lea.hbm %s1709_s9, %s1093_s17 }
 0x22a   : > { %v539_v43 = vpop.permute.xlu2 %538 }
 0x232   : > { %v653_v46 = vpop.permute.xlu2 %652 }
 0x233   : > { %v658_v49 = vsel %vm481_vm5, %v653_v46, 0 }
 0x23a   : > { %v595_v52 = vpop.permute.xlu2 %594 }
 0x240   : > { %v480_v44 = vpop.permute.xlu1 %479 }
 0x241   : > { %v486_v45 = vsel %vm481_vm5, %v480_v44, 0 }
 0x242   : > { %495 = vmatpush.bf16.xpose.msra.mxu1 %v486_v45  ;;  %v651_v53 = vpop.permute.xlu0 %650 }
 0x248   : > { %v541_v47 = vpop.permute.xlu1 %540 }
 0x249   : > { %1049 = vmatmul.msk.bf16.vlgmr.msra.gmra.mxu1 %vm481_vm5, %v470_v37  ;;  %v546_v48 = vsel %vm481_vm5, %v541_v47, 0 }
 0x24a   : > { %555 = vmatpush.bf16.xpose.msra.mxu3 %v546_v48 }
 0x250   : > { %v597_v50 = vpop.permute.xlu1 %596 }
 0x251   : > { %1051 = vmatmul.msk.bf16.vlgmr.msra.gmra.mxu3 %vm481_vm5, %v539_v43  ;;  %v602_v51 = vsel %vm481_vm5, %v597_v50, 0 }
 0x252   : > { %667 = vmatpush.bf16.xpose.msrb.mxu3 %v658_v49  ;;  %611 = vmatpush.bf16.xpose.msrb.mxu0 %v602_v51 }
 0x259   : > { %1053 = vmatmul.msk.bf16.vlgmr.msrb.gmra.mxu0 %vm481_vm5, %v595_v52 }
 0x261   : > { %1055 = vmatmul.msk.bf16.vlgmr.msrb.gmra.mxu3 %vm481_vm5, %v651_v53 }
 0x2c6   : > { %v497_v55 = vpop.f32.mrf.mxu1 }
 0x2c7   : > { %v498_v56 = vadd.f32 %v1193_v54, %v497_v55 }
 0x2c9   : > { %v501_v57 = vsel %vm481_vm5, %v498_v56, -inf }
 0x2ca   : > { %502 = vmax.xlane.f32.xlu1 %v501_v57 }
 0x2ce   : > { %v499_v58 = vpop.f32.mrf.mxu1 }
 0x2d4   : > { %v557_v59 = vpop.f32.mrf.mxu3 }
 0x2d5   : > { %v558_v60 = vadd.f32 %v1193_v54, %v557_v59 }
 0x2d6   : > { %v613_v61 = vpop.f32.mrf.mxu0 }
 0x2d7   : > { %v561_v62 = vsel %vm481_vm5, %v558_v60, -inf  ;;  %v614_v63 = vadd.f32 %v1193_v54, %v613_v61  ;;  %v1099_v61 = vld [vmem:[%s1704_s4 + $0x8] sm:$0xff] }
 0x2d8   : > { %562 = vmax.xlane.f32.xlu2 %v561_v62  ;;  %753 = vmatpush.bf16.msra.mxu0 %v1099_v61  ;;  %v1098_v62 = vld [vmem:[%s1704_s4] sm:$0xff] }
 0x2d9   : > { %v617_v2 = vsel %vm481_vm5, %v614_v63, -inf }
 0x2dc   : > { %v559_v0 = vpop.f32.mrf.mxu3  ;;  %754 = vmatpush.bf16.msra.mxu0 %v1098_v62 }
 0x2de   : > { %v615_v1 = vpop.f32.mrf.mxu0 }
 0x2e0   : > { %618 = vmax.xlane.f32.xlu2 %v617_v2 }
 0x2e4   : > { %v669_v3 = vpop.f32.mrf.mxu3 }
 0x2e5   : > { %v670_v4 = vadd.f32 %v1193_v54, %v669_v3 }
 0x2e7   : > { %v673_v5 = vsel %vm481_vm5, %v670_v4, -inf }
 0x2e8   : > { %674 = vmax.xlane.f32.xlu0 %v673_v5 }
 0x2ec   : > { %v671_v6 = vpop.f32.mrf.mxu3 }
 0x2f8   : > { %513 = vrot.lane.b32.xlu2 %v1595_v39, %s1401_s23  ;;  %s389_s23 = scalar_lea.vmem [#allocation9], %s1038_s8 }
 0x2fc   : > { %573 = vrot.lane.b32.xlu0 %v1595_v39, %s1402_s27  ;;  %s930_s27 = sshll.u32 %s389_s23, 4  ;;  %s931_s27 = int_to_ptr.vmem [resolvable:$true] %s930_s27 }
 0x300   : > { %685 = vrot.lane.b32.xlu2 %v1595_v39, %s1403_s13  ;;  %s932_s13 = sshll.u32 %s928_s15, 4  ;;  %s933_s13 = int_to_ptr.hbm [resolvable:$true] %s932_s13 }
 0x304   : > { %629 = vrot.lane.b32.xlu0 %v1595_v39, %s1404_s24  ;;  %s1331_s24 = sshra.s32 %s933_s13, 4  ;;  %s1332_s24 = int_to_ptr.hbm [resolvable:$true] %s1331_s24 }
 0x305   : > { %p1338_p7 = scmp.lt.s32.totalorder %s1332_s24, %s1709_s9 }
 0x33d   : > { %v503_v7 = vpop.xlane.xlu1 %502 }
 0x33e   : > { %v504_v9 = vsub.f32 %v498_v56, %v503_v7  ;;  %v1194_v7 = vld [vmem:[#allocation8] ss:$0 sm:$0xff] }
 0x340   : > { %v505_v10 = vmul.f32 1.442695, %v504_v9 }
 0x342   : > { %1205 = vpow2.f32 %v505_v10 }
 0x348   : > { %v1206_v11 = vpop.eup %1205 }
 0x349   : > { %v507_v12 = vsel %vm481_vm5, %v1206_v11, 0.0 }
 0x34a   : > { %508 = vadd.xlane.f32.xlu1 %v507_v12 }
 0x34b   : > { %v563_v13 = vpop.xlane.xlu2 %562 }
 0x34c   : > { %v564_v14 = vsub.f32 %v558_v60, %v563_v13 }
 0x34e   : > { %v565_v15 = vmul.f32 1.442695, %v564_v14 }
 0x350   : > { %1207 = vpow2.f32 %v565_v15 }
 0x353   : > { %v619_v16 = vpop.xlane.xlu2 %618 }
 0x354   : > { %v620_v23 = vsub.f32 %v614_v63, %v619_v16 }
 0x356   : > { %v1208_v17 = vpop.eup %1207  ;;  %v621_v25 = vmul.f32 1.442695, %v620_v23 }
 0x357   : > { %v567_v18 = vsel %vm481_vm5, %v1208_v17, 0.0 }
 0x358   : > { %568 = vadd.xlane.f32.xlu1 %v567_v18 }
 0x35b   : > { %v675_v19 = vpop.xlane.xlu0 %674  ;;  %v514_v20 = vpop.permute.xlu2 %513 }
 0x35c   : > { %v676_v21 = vsub.f32 %v670_v4, %v675_v19  ;;  %v520_v22 = vsel %vm518_vm6, %v514_v20, 0  ;;  %v1101_v19 = vld [vmem:[#allocation6 + $0x8] sm:$0xff]  ;;  %v1100_v20 = vld [vmem:[#allocation6] sm:$0xff] }
 0x35d   : > { %529 = vmatpush.bf16.msra.mxu2 %v520_v22 }
 0x35e   : > { %v677_v24 = vmul.f32 1.442695, %v676_v21 }
 0x360   : > { %1209 = vpow2.f32 %v677_v24 }
 0x361   : > { %1211 = vpow2.f32 %v621_v25 }
 0x363   : > { %v686_v38 = vpop.permute.xlu2 %685 }
 0x364   : > { %v691_v40 = vsel %vm518_vm6, %v686_v38, 0  ;;  %v1104_v38 = vld [vmem:[%s1707_s7 + $0x10] sm:$0xff] }
 0x366   : > { %v1210_v26 = vpop.eup %1209 }
 0x367   : > { %v679_v27 = vsel %vm481_vm5, %v1210_v26, 0.0  ;;  %v1212_v28 = vpop.eup %1211 }
 0x368   : > { %680 = vadd.xlane.f32.xlu1 %v679_v27  ;;  %v623_v32 = vsel %vm481_vm5, %v1212_v28, 0.0 }
 0x36e   : > { %v574_v29 = vpop.permute.xlu0 %573 }
 0x36f   : > { %v579_v31 = vsel %vm518_vm6, %v574_v29, 0  ;;  %v1195_v29 = vld [vmem:[#allocation8 + $0x1] ss:$0 sm:$0xff] }
 0x370   : > { %588 = vmatpush.bf16.msrb.mxu2 %v579_v31  ;;  %624 = vadd.xlane.f32.xlu1 %v623_v32  ;;  %v1196_v32 = vld [vmem:[#allocation8 + $0x2] ss:$0 sm:$0xff] }
 0x376   : > { %v630_v33 = vpop.permute.xlu0 %629 }
 0x377   : > { %v635_v34 = vsel %vm518_vm6, %v630_v33, 0 }
 0x378   : > { %644 = vmatpush.bf16.msrb.mxu1 %v635_v34 }
 0x37c   : > { %819 = vmatpush.bf16.msra.mxu1 %v1101_v19 }
 0x380   : > { %820 = vmatpush.bf16.msra.mxu1 %v1100_v20 }
 0x3bd   : > { %v509_v35 = vpop.xlane.xlu1 %508 }
 0x3be   : > { %1213 = vrcp.f32 %v509_v35 }
 0x3c4   : > { %v1214_v36 = vpop.eup %1213 }
 0x3c5   : > { %v511_v37 = vmul.f32 %v1214_v36, %v1206_v11 }
 0x3c7   : > { %v512_v39 = vpack.c.bf16 %v511_v37, %v511_v37  ;;  %v1105_v37 = vld [vmem:[%s1707_s7 + $0x18] sm:$0xff] }
 0x3c8   : > { %878 = vmatpush.bf16.msra.mxu3 %v1105_v37 }
 0x3c9   : > { %1050 = vmatmul.msk.bf16.vlgmr.msra.gmra.mxu2 %vm481_vm5, %v512_v39  ;;  %v1103_v39 = vld [vmem:[%s1707_s7 + $0x8] sm:$0xff] }
 0x3ca   : > { %700 = vmatpush.bf16.msra.mxu2 %v691_v40  ;;  %v1102_v40 = vld [vmem:[%s1707_s7] sm:$0xff] }
 0x3cb   : > { %v569_v41 = vpop.xlane.xlu1 %568 }
 0x3cc   : > { %1215 = vrcp.f32 %v569_v41  ;;  %879 = vmatpush.bf16.msra.mxu3 %v1104_v38  ;;  %v1197_v41 = vld [vmem:[%s1706_s6] ss:$0 sm:$0xff] }
 0x3d0   : > { %880 = vmatpush.bf16.msra.mxu3 %v1103_v39 }
 0x3d2   : > { %v1216_v42 = vpop.eup %1215 }
 0x3d3   : > { %v571_v43 = vmul.f32 %v1216_v42, %v1208_v17 }
 0x3d4   : > { %881 = vmatpush.bf16.msra.mxu3 %v1102_v40 }
 0x3d5   : > { %v572_v44 = vpack.c.bf16 %v571_v43, %v571_v43 }
 0x3d9   : > { %1052 = vmatmul.msk.bf16.vlgmr.msrb.gmra.mxu2 %vm481_vm5, %v572_v44 }
 0x3db   : > { %v681_v45 = vpop.xlane.xlu1 %680 }
 0x3dc   : > { %1217 = vrcp.f32 %v681_v45 }
 0x3e2   : > { %v1218_v46 = vpop.eup %1217 }
 0x3e3   : > { %v683_v47 = vmul.f32 %v1218_v46, %v1210_v26  ;;  %v625_v48 = vpop.xlane.xlu1 %624 }
 0x3e4   : > { %1219 = vrcp.f32 %v625_v48 }
 0x3e5   : > { %v684_v49 = vpack.c.bf16 %v683_v47, %v683_v47 }
 0x3e9   : > { %1056 = vmatmul.msk.bf16.vlgmr.msra.gmra.mxu2 %vm481_vm5, %v684_v49 }
 0x3ea   : > { %v1220_v50 = vpop.eup %1219 }
 0x3eb   : > { %v627_v51 = vmul.f32 %v1220_v50, %v1212_v28 }
 0x3ed   : > { %v628_v52 = vpack.c.bf16 %v627_v51, %v627_v51 }
 0x3ef   : > { %1054 = vmatmul.msk.bf16.vlgmr.msrb.gmra.mxu1 %vm481_vm5, %v628_v52 }
 0x44c   : > { %v531_v53 = vpop.f32.mrf.mxu2 }
 0x454   : > { %v533_v54 = vpop.f32.mrf.mxu2 }
 0x45c   : > { %v590_v55 = vpop.f32.mrf.mxu2 }
 0x45d   : > { %707 = vrot.lane.b32.xlu1 %v590_v55, %s1405_s25  ;;  %v1198_v55 = vld [vmem:[#allocation8 + $0x3] ss:$0 sm:$0xff]  ;;  %s1333_s25 = scalar_lea.hbm %s1332_s24, 8 }
 0x45e   : > { %p1334_p1 = scmp.ne.s32.totalorder %s1332_s24, %s1333_s25  ;;  %p1339_p8 = scmp.lt.s32.totalorder %s1337_s5, %s1333_s25 }
 0x460   : > { %p1335_p5 = pnand %p1334_p1, %p1527_p4  ;;  %p1340_p9 = por %p1339_p8, %p1338_p7 }
 0x462   : > { %p1336_p12 = pneg %p1335_p5 }
 0x464   : > { %v592_v56 = vpop.f32.mrf.mxu2  ;;  %p1341_p10 = pnand %p1340_p9, %p1336_p12 }
 0x46c   : > { %v646_v57 = vpop.f32.mrf.mxu1  ;;  %v702_v58 = vpop.f32.mrf.mxu2 }
 0x46d   : > { %715 = vrot.lane.b32.xlu0 %v702_v58, %s1406_s18  ;;  %711 = vrot.lane.b32.xlu2 %v646_v57, %s1407_s22 }
 0x474   : > { %v648_v59 = vpop.f32.mrf.mxu1  ;;  %v704_v60 = vpop.f32.mrf.mxu2 }
 0x4c7   : > { %v712_v1 = vpop.permute.xlu2 %711 }
 0x4cf   : > { %v708_v63 = vpop.permute.xlu1 %707 }
 0x4d0   : > { %v718_v0 = vsel %vm481_vm5, %v531_v53, %v708_v63 }
 0x4d1   : > { %v720_v3 = vsel %vm719_vm7, %v718_v0, %v712_v1 }
 0x4df   : > { %v716_v2 = vpop.permute.xlu0 %715 }
 0x4e0   : > { %v722_v4 = vsel %vm721_vm8, %v720_v3, %v716_v2 }
 0x4e1   : > { %723 = vst.msk [vmem:[#allocation2] sm:$0xff] %vm398_vm0, %v722_v4 }
 0x4e8   : > { %v724_v5 = vld [vmem:[#allocation2] sm:$0xff] }
 0x4e9   : > { %v725_v6 = vpack.c.bf16 %v724_v5, %v724_v5 }
 0x4eb   : > { %1065 = vmatmul.msk.bf16.vlgmr.msra.gmra.mxu0 %vm398_vm0, %v725_v6 }
 0x568   : > { %v756_v9 = vpop.f32.mrf.mxu0 }
 0x569   : > { %v757_v10 = vadd.f32 %v1194_v7, %v756_v9 }
 0x56b   : > { %v760_v11 = vadd.f32 %v757_v10, %v1587_v30 }
 0x56d   : > { %v763_v12 = vsel %vm398_vm0, %v760_v11, 0.0 }
 0x56e   : > { %764 = vadd.xlane.f32.xlu2 %v763_v12  ;;  %v1199_v12 = vld [vmem:[#allocation8 + $0x4] ss:$0 sm:$0xff] }
 0x570   : > { %v758_v13 = vpop.f32.mrf.mxu0 }
 0x5e1   : > { %v765_v14 = vpop.xlane.xlu2 %764 }
 0x5e2   : > { %v766_v15 = vmul.f32 %v765_v14, %v1576_v8  ;;  %v1200_v14 = vld [vmem:[#allocation8 + $0x5] ss:$0 sm:$0xff] }
 0x5e4   : > { %v767_v16 = vsub.f32 %v760_v11, %v766_v15 }
 0x5e6   : > { %v768_v17 = vmul.f32 %v767_v16, %v767_v16 }
 0x5e8   : > { %v769_v18 = vsel %vm398_vm0, %v768_v17, 0.0 }
 0x5e9   : > { %770 = vadd.xlane.f32.xlu0 %v769_v18 }
 0x65c   : > { %v771_v21 = vpop.xlane.xlu0 %770 }
 0x65d   : > { %v772_v22 = vmul.f32 %v771_v21, %v1576_v8 }
 0x65f   : > { %v773_v30 = vadd.f32 1e-12, %v772_v22 }
 0x661   : > { %1221 = vrsqrt.f32 %v773_v30  ;;  %vm780_vm10 = vweird.f32 %v773_v30 }
 0x667   : > { %v1222_v23 = vpop.eup %1221 }
 0x668   : > { %v775_v24 = vmul.f32 %v1222_v23, %v773_v30  ;;  %vm781_vm9 = vweird.f32 %v1222_v23 }
 0x669   : > { %vm782_vm11 = vmor %vm780_vm10, %vm781_vm9 }
 0x66a   : > { %v776_v25 = vmul.f32 %v1222_v23, %v775_v24 }
 0x66c   : > { %v777_v26 = vmul.f32 0.5, %v776_v25 }
 0x66e   : > { %v778_v27 = vsub.f32 1.5, %v777_v26 }
 0x670   : > { %v779_v28 = vmul.f32 %v1222_v23, %v778_v27 }
 0x672   : > { %v783_v31 = vsel %vm782_vm11, %v1222_v23, %v779_v28 }
 0x673   : > { %v784_v33 = vmul.f32 %v783_v31, %v767_v16 }
 0x675   : > { %v786_v34 = vmul.f32 %v1195_v29, %v784_v33 }
 0x677   : > { %v788_v35 = vadd.f32 %v1196_v32, %v786_v34 }
 0x679   : > { %v789_v36 = vpack.c.bf16 %v788_v35, %v788_v35 }
 0x67b   : > { %1074 = vmatmul.msk.bf16.vlgmr.msra.gmra.mxu1 %vm398_vm0, %v789_v36 }
 0x6f8   : > { %v822_v42 = vpop.f32.mrf.mxu1 }
 0x6f9   : > { %v823_v43 = vadd.f32 %v1197_v41, %v822_v42 }
 0x6fb   : > { %v827_v44 = vmul.f32 0.044715, %v823_v43  ;;  %v826_v51 = vmul.f32 0.5, %v823_v43 }
 0x6fd   : > { %v828_v45 = vmul.f32 %v827_v44, %v823_v43 }
 0x6ff   : > { %v829_v46 = vmul.f32 %v828_v45, %v823_v43 }
 0x700   : > { %v824_v47 = vpop.f32.mrf.mxu1 }
 0x701   : > { %v830_v48 = vadd.f32 %v829_v46, %v823_v43 }
 0x703   : > { %v831_v49 = vmul.f32 0.7978846, %v830_v48 }
 0x705   : > { %1223 = vtanh.f32 %v831_v49 }
 0x70b   : > { %v1224_v50 = vpop.eup %1223 }
 0x70c   : > { %v833_v52 = vadd.f32 1.0, %v1224_v50 }
 0x70e   : > { %v834_v53 = vmul.f32 %v833_v52, %v826_v51 }
 0x710   : > { %v835_v54 = vpack.c.bf16 %v834_v53, %v834_v53 }
 0x712   : > { %1091 = vmatmul.msk.bf16.vlgmr.msra.gmra.mxu3 %vm870_vm12, %v835_v54 }
 0x795   : > { %v883_v56 = vpop.f32.mrf.mxu3 }
 0x796   : > { %v884_v57 = vadd.f32 %v1198_v55, %v883_v56 }
 0x798   : > { %v887_v58 = vadd.f32 %v884_v57, %v788_v35 }
 0x79a   : > { %v890_v59 = vsel %vm398_vm0, %v887_v58, 0.0 }
 0x79b   : > { %891 = vadd.xlane.f32.xlu1 %v890_v59 }
 0x79d   : > { %v885_v60 = vpop.f32.mrf.mxu3 }
 0x80e   : > { %v892_v61 = vpop.xlane.xlu1 %891 }
 0x80f   : > { %v893_v62 = vmul.f32 %v892_v61, %v1576_v8 }
 0x811   : > { %v894_v63 = vsub.f32 %v887_v58, %v893_v62 }
 0x813   : > { %v895_v0 = vmul.f32 %v894_v63, %v894_v63 }
 0x815   : > { %v896_v1 = vsel %vm398_vm0, %v895_v0, 0.0 }
 0x816   : > { %897 = vadd.xlane.f32.xlu2 %v896_v1 }
 0x889   : > { %v898_v2 = vpop.xlane.xlu2 %897 }
 0x88a   : > { %v899_v3 = vmul.f32 %v898_v2, %v1576_v8 }
 0x88c   : > { %v900_v4 = vadd.f32 1e-12, %v899_v3 }
 0x88e   : > { %1225 = vrsqrt.f32 %v900_v4  ;;  %vm907_vm14 = vweird.f32 %v900_v4 }
 0x894   : > { %v1226_v5 = vpop.eup %1225 }
 0x895   : > { %v902_v6 = vmul.f32 %v1226_v5, %v900_v4  ;;  %vm908_vm13 = vweird.f32 %v1226_v5 }
 0x896   : > { %vm909_vm15 = vmor %vm907_vm14, %vm908_vm13 }
 0x897   : > { %v903_v7 = vmul.f32 %v1226_v5, %v902_v6 }
 0x899   : > { %v904_v9 = vmul.f32 0.5, %v903_v7 }
 0x89b   : > { %v905_v10 = vsub.f32 1.5, %v904_v9 }
 0x89d   : > { %v906_v11 = vmul.f32 %v1226_v5, %v905_v10 }
 0x89f   : > { %v910_v8 = vsel %vm909_vm15, %v1226_v5, %v906_v11 }
 0x8a0   : > { %v911_v13 = vmul.f32 %v910_v8, %v894_v63 }
 0x8a2   : > { %v913_v15 = vmul.f32 %v1199_v12, %v911_v13 }
 0x8a4   : > { %v915_v16 = vadd.f32 %v1200_v14, %v913_v15 }
 0x8a6   : > { %916 = vst.msk [vmem:[%s389_s23] sm:$0xff] %vm398_vm0, %v915_v16 }
 0x8a7   : > { %1344 = shalt.err (!%p1341_p10)
}
 0x8a8   : > { %1116 = dma.vmem_to_hbm [thread:$0]  (%p1527_p4), %s931_s27, 128, %s933_s13, %s918_s16  }
 0x8a9 PF: > { %s944_s19 = sand.u32 1, %s1375_s30   ;;  %p1720_p13 = scmp.ge.s32.totalorder %s1387_s12, 2 }
 0x8aa   : > { %s945_s26 = scalar_lea.sflag [#allocation5], %s944_s19 }
 0x8ab   : > { %p1130_p11 = pnand %p1720_p13, %p1531_p6 }
 0x8ad   : > { %p1131_p0 = pneg %p1130_p11 }
 0x8af   : > { %1370 = dma.done.wait (%p1131_p0), %s945_s26, 128  }
 0x8b0   : > { %1372 = vsyncadd (%p1131_p0), %s945_s26, 4294967168  ;;  %p23_p2 = scmp.ge.s32.totalorder %s1501_s28, 4   ;;  %s1721_s30 = smov %s1379_s10 }
 0x8b1   : > { %s1722_s10 = smov %s1383_s11  ;;  %s1723_s11 = smov %s1512_s14 }
 0x8b2   : > { %s1724_s12 = smov %s1501_s28  ;;  %25 = sbr.rel (!%p23_p2) target bundleno = 9 (0x9), region = 112 }
 0x8b7   :  { %951 = vsyncpa [#allocation4], 1 }
 0x8b8   :  { %953 = vsyncpa [#allocation4 + $0x1], 1 }
 0x8b9   :  { %954 = vsyncpa [#allocation7], 1 }
 0x8ba   :  { %955 = vsyncpa [#allocation5], 1 }
 0x8bb   :  { %957 = vsyncpa [#allocation5 + $0x1], 1 }

</bundles_post_ra>
